<compile_context>
chip_gen: v6e
topology: v6e:2x2x1
jax: 0.10.0
libtpu: 0.0.40
codegen_flags: <defaults>
</compile_context>

<pallas_src>
import functools

import jax
import jax.numpy as jnp
from jax import lax
from jax.experimental import pallas as pl
from jax.experimental.pallas import tpu as pltpu


def _round_up(x, n):
    return -(-x // n) * n


# ----------------------------------------------------------------------------
# Pallas kernel: fused mean + conv1 + grouped 5x5 depth_conv + conv2 as a
# single (Mr+8, 128) @ (128, T) MXU matmul per row tile.
# ----------------------------------------------------------------------------
def _illum_kernel(img_ref,   # (1, 4, LF)    planar flat [R,G,B,inside] image
                  wstk_ref,  # (Mr+8, 128)   stacked fused weights (K padded)
                  bstk_ref,  # (Mr+8, 1)     stacked biases
                  fea_ref,   # out: (1, M, T)
                  map_ref,   # out: (1, 8, T)  rows 0..2 = illu_map, 3..7 = 0
                  *, w, m, mr, band_len):
    t_pix = fea_ref.shape[2]

    # Aligned dynamic window of the flat planar image covering this row tile
    # plus its 4-row halo (+4-lane guard for the dx offsets).
    lane0 = pl.multiple_of(pl.program_id(1) * t_pix, 128)
    band = img_ref[0, :, pl.ds(lane0, band_len)]              # (4, band_len)
    dt = band.dtype

    # Width-border masks (zero padding of the 5x5 conv along W): flat pixel t
    # has column t % w; tap column col + dx - 2 must stay inside [0, w).
    col = lax.broadcasted_iota(jnp.int32, (1, t_pix), 1) % w
    masks = []
    for dx in range(5):
        lo, hi = 2 - dx, w + 1 - dx
        if lo <= 0 and hi >= w - 1:                           # dx == 2: all valid
            masks.append(None)
        else:
            masks.append(jnp.logical_and(col >= lo, col <= hi).astype(dt))

    # im2col slab (K=128, T): taps stacked on sublanes (4 channel rows per
    # tap), pixels on lanes.  Each tap is a static lane-offset slice of the
    # aligned band -> a cheap static lane rotation, no channel-last reshapes.
    pieces = []
    for dy in range(5):
        for dx in range(5):
            off = dy * w + dx
            p = band[:, off:off + t_pix]                      # (4, T)
            if masks[dx] is not None:
                p = p * masks[dx]
            pieces.append(p)
    pieces.append(jnp.zeros((128 - 4 * 25, t_pix), dt))       # pad K: 100 -> 128
    slab = jnp.concatenate(pieces, axis=0)                    # (128, T)

    # Single MXU matmul; rows [:m] = illu_fea, rows [mr:mr+3] = illu_map.
    res = lax.dot_general(wstk_ref[...], slab,
                          dimension_numbers=(((1,), (0,)), ((), ())),
                          preferred_element_type=jnp.float32)
    res = res + bstk_ref[...]
    fea_ref[0] = res[:m].astype(fea_ref.dtype)
    map_ref[0] = res[mr:].astype(map_ref.dtype)


# ----------------------------------------------------------------------------
# Tile-size selection (accounts for double-buffered outputs, the (128,T) slab
# and the resident planar image; safe on v7x's smaller VMEM).
# ----------------------------------------------------------------------------
def _tile_vmem_bytes(t_pix, m, h, w, in_itemsize):
    mr = _round_up(m, 8)
    img_block = 2 * 8 * _round_up(h * w + 4 * w + 4, 128) * in_itemsize
    outs = 2 * (mr + 8) * t_pix * 4                 # f32 outputs, double-buffered
    slab = 2 * 128 * t_pix * in_itemsize            # slab + piece intermediates
    weights = 2 * (mr + 8) * (128 * in_itemsize + 4)
    return img_block + outs + slab + weights


def _pick_tile_rows(h, w, m, in_itemsize=4, budget=12 * 1024 * 1024):
    """Largest TH with TH | H and TH*W lane-aligned (or TH == H) whose VMEM
    estimate fits the budget; prefers TH*W % 256 == 0 when that costs <= 2x."""
    legal = [th for th in range(1, h + 1)
             if h % th == 0 and ((th * w) % 128 == 0 or th == h)]
    fitting = [th for th in legal
               if _tile_vmem_bytes(th * w, m, h, w, in_itemsize) <= budget]
    pool = fitting if fitting else legal[:1]        # smallest legal as fallback
    best = max(pool)
    pref = [th for th in pool if (th * w) % 256 == 0]
    if pref and 2 * max(pref) >= best:
        return max(pref)
    return best


# ----------------------------------------------------------------------------
# Wrapper (NCHW in / NCHW out, like the PyTorch module)
# ----------------------------------------------------------------------------
@functools.partial(jax.jit,
                   static_argnames=("n_fea_middle", "tile_rows", "mxu_dtype"))
def illumination_estimator(img_nchw, params, n_fea_middle, tile_rows=None,
                           mxu_dtype=jnp.float32):
    b, c, h, w = img_nchw.shape
    assert c == 3
    m = n_fea_middle
    assert m % 4 == 0, "depth_conv uses groups=4"
    mr = _round_up(m, 8)

    wstk, bstk = params
    in_itemsize = jnp.dtype(mxu_dtype).itemsize

    th = tile_rows if tile_rows is not None else _pick_tile_rows(
        h, w, m, in_itemsize)
    assert h % th == 0 and ((th * w) % 128 == 0 or th == h), (
        "tile_rows must divide H and give a lane-aligned (or full-image) tile")
    n_tiles = h // th
    t_pix = th * w
    band_len = t_pix + 4 * w + 4            # tile + 4-row halo + dx guard
    lf = h * w + 4 * w + 4                  # flat planar image length

    # Planar flat [R,G,B,inside] image: channels on sublanes, flattened pixels
    # on lanes; 2-row height zero pad folded in, 2-element guard zeros at both
    # ends.  The "inside" indicator carries conv1's bias through the fused
    # weight so the zero padding of x_1 is reproduced exactly at the borders.
    img4 = jnp.concatenate(
        [img_nchw, jnp.ones((b, 1, h, w), img_nchw.dtype)], axis=1)
    imgp = jnp.pad(img4, ((0, 0), (0, 0), (2, 2), (0, 0)))        # (B,4,H+4,W)
    imgf = jnp.pad(imgp.reshape(b, 4, (h + 4) * w),
                   ((0, 0), (0, 0), (2, 2))).astype(mxu_dtype)    # (B,4,LF)
    wstk_c = wstk.astype(mxu_dtype)

    kernel = functools.partial(_illum_kernel, w=w, m=m, mr=mr,
                               band_len=band_len)

    cost = pl.CostEstimate(
        flops=2 * (mr + 8) * 128 * b * h * w,
        transcendentals=0,
        bytes_accessed=(imgf.size * in_itemsize + wstk_c.size * in_itemsize
                        + bstk.size * 4 + b * (m + 8) * h * w * 4))

    fea_flat, map_flat = pl.pallas_call(
        kernel,
        out_shape=(
            jax.ShapeDtypeStruct((b, m, h * w), jnp.float32),
            jax.ShapeDtypeStruct((b, 8, h * w), jnp.float32),
        ),
        grid_spec=pltpu.PrefetchScalarGridSpec(
            num_scalar_prefetch=0,
            grid=(b, n_tiles),
            in_specs=[
                # Whole flat planar image per batch element; constant block
                # index along the tile axis -> DMA'd once per image and reused
                # by every row tile (cheap halo handling).  Planar layout keeps
                # it ~32 B/pixel resident (no 128-lane channel padding).
                # TODO(synk): for very large images switch to manually DMA'd
                # overlapping row windows (memory_space=pl.ANY + halo copies)
                # so the resident footprint scales with TH, not H (v7x 64 MiB).
                pl.BlockSpec((1, 4, lf), lambda bi, ti: (bi, 0, 0)),
                pl.BlockSpec((mr + 8, 128), lambda bi, ti: (0, 0)),
                pl.BlockSpec((mr + 8, 1), lambda bi, ti: (0, 0)),
            ],
            out_specs=[
                pl.BlockSpec((1, m, t_pix), lambda bi, ti: (bi, 0, ti)),
                pl.BlockSpec((1, 8, t_pix), lambda bi, ti: (bi, 0, ti)),
            ],
        ),
        compiler_params=pltpu.CompilerParams(
            dimension_semantics=("parallel", "parallel"),
            vmem_limit_bytes=32 * 1024 * 1024),
        cost_estimate=cost,
    )(imgf, wstk_c, bstk)

    # Row-major reshape only (free) — data is already NCHW-ordered.
    illu_fea = fea_flat.reshape(b, m, h, w)
    illu_map = map_flat[:, :3, :].reshape(b, 3, h, w)
    return illu_fea, illu_map


# ----------------------------------------------------------------------------
# Parameter construction (PyTorch layouts -> fused, stacked kernel layouts)
# ----------------------------------------------------------------------------
def make_params(key, n_fea_middle, n_fea_in=4, n_fea_out=3):
    m = n_fea_middle
    mr = _round_up(m, 8)
    gs = m // n_fea_in
    ks = jax.random.split(key, 6)
    # PyTorch-layout parameters.
    w1 = jax.random.normal(ks[0], (m, n_fea_in, 1, 1), jnp.float32) * 0.1
    b1 = jax.random.normal(ks[1], (m,), jnp.float32) * 0.1
    wd = jax.random.normal(ks[2], (m, gs, 5, 5), jnp.float32) * 0.1
    bd = jax.random.normal(ks[3], (m,), jnp.float32) * 0.1
    w2 = jax.random.normal(ks[4], (n_fea_out, m, 1, 1), jnp.float32) * 0.1
    b2 = jax.random.normal(ks[5], (n_fea_out,), jnp.float32) * 0.1

    # conv1 on [R,G,B,mean(RGB)] == conv1_eff on [R,G,B]:
    #   w1_eff[c, :] = w1[:, c] + w1[:, 3] / 3
    w1_2d = w1[:, :, 0, 0]                               # (M, 4)
    w1_eff = (w1_2d[:, :3] + w1_2d[:, 3:4] / 3.0).T      # (3, M)

    # depth_conv: groups=4; out channel m = g*gs + o reads in channels g*gs+j.
    w1_eff_g = w1_eff.reshape(3, n_fea_in, gs)           # (c, g, j)
    b1_g = b1.reshape(n_fea_in, gs)                      # (g, j)
    wd_r = wd.reshape(n_fea_in, gs, gs, 25)              # (g, o, j, tap)

    # Fused weight, K ordered as (tap, [R,G,B,inside]); the "inside" channel
    # carries conv1's bias so zero padding of x_1 is matched at the borders.
    weff_rgb = jnp.einsum("cgj,gojt->tcgo", w1_eff_g, wd_r).reshape(25, 3, m)
    weff_one = jnp.einsum("gj,gojt->tgo", b1_g, wd_r).reshape(25, 1, m)
    weff = jnp.concatenate([weff_rgb, weff_one], axis=1).reshape(100, m).T  # (M,100)

    # conv2 (1x1, M->3) folded in:  map = (w2 @ weff) slab + (w2 @ bd + b2)
    w2_2d = w2[:, :, 0, 0]                               # (3, M)
    w2eff = w2_2d @ weff                                 # (3, 100)
    b2eff = w2_2d @ bd + b2                              # (3,)

    # Stacked weight/bias: rows [0:M) fea, [M:Mr) zero, [Mr:Mr+3) map,
    # [Mr+3:Mr+8) zero; K padded 100 -> 128.
    wstk = jnp.zeros((mr + 8, 128), jnp.float32)
    wstk = wstk.at[:m, :100].set(weff)
    wstk = wstk.at[mr:mr + 3, :100].set(w2eff)
    bstk = jnp.zeros((mr + 8, 1), jnp.float32)
    bstk = bstk.at[:m, 0].set(bd)
    bstk = bstk.at[mr:mr + 3, 0].set(b2eff)

    kernel_params = (wstk, bstk)
    torch_params = (w1, b1, wd, bd, w2, b2)
    return kernel_params, torch_params


# ----------------------------------------------------------------------------
# Pure-JAX reference (mirrors the PyTorch forward exactly, NCHW)
# ----------------------------------------------------------------------------
def reference_forward(img_nchw, torch_params, groups=4):
    w1, b1, wd, bd, w2, b2 = torch_params
    dn = ("NCHW", "OIHW", "NCHW")
    mean_c = img_nchw.mean(axis=1, keepdims=True)
    inp = jnp.concatenate([img_nchw, mean_c], axis=1)
    x1 = lax.conv_general_dilated(inp, w1, (1, 1), "VALID",
                                  dimension_numbers=dn)
    x1 = x1 + b1[None, :, None, None]
    fea = lax.conv_general_dilated(x1, wd, (1, 1), [(2, 2), (2, 2)],
                                   dimension_numbers=dn,
                                   feature_group_count=groups)
    fea = fea + bd[None, :, None, None]
    out = lax.conv_general_dilated(fea, w2, (1, 1), "VALID",
                                   dimension_numbers=dn)
    out = out + b2[None, :, None, None]
    return fea, out


if __name__ == "__main__":
    B, C, H, W = 2, 3, 16, 16
    n_fea_middle = 16

    key = jax.random.PRNGKey(0)
    k_img, k_par = jax.random.split(key)
    img = jax.random.normal(k_img, (B, C, H, W), jnp.float32)

    kernel_params, torch_params = make_params(k_par, n_fea_middle)
    ref_fea, ref_map = reference_forward(img, torch_params)

    # f32 MXU path with forced row tiling (grid=(2,2), T = 8*16 = 128) so the
    # halo, width-mask and lane-offset paths are exercised.
    illu_fea, illu_map = illumination_estimator(img, kernel_params,
                                                n_fea_middle, tile_rows=8)
    jax.block_until_ready((illu_fea, illu_map))
    assert illu_fea.shape == (B, n_fea_middle, H, W)
    assert illu_map.shape == (B, 3, H, W)
    assert jnp.allclose(illu_fea, ref_fea, atol=2e-4, rtol=2e-4)
    assert jnp.allclose(illu_map, ref_map, atol=2e-4, rtol=2e-4)

    # bf16 MXU inputs (v6e/v7x fast path), automatic tile selection.
    fea_bf, map_bf = illumination_estimator(img, kernel_params, n_fea_middle,
                                            mxu_dtype=jnp.bfloat16)
    jax.block_until_ready((fea_bf, map_bf))
    assert jnp.allclose(fea_bf, ref_fea, atol=5e-2, rtol=5e-2)
    assert jnp.allclose(map_bf, ref_map, atol=5e-2, rtol=5e-2)

    print("KERNEL_OK")
</pallas_src>

<mosaic_0001>
module attributes {stable_mosaic.version = 11 : i64} {
  func.func @_illum_kernel(%arg0: i32, %arg1: i32, %arg2: memref<1x4x324xf32, #tpu.memory_space<vmem>>, %arg3: memref<24x128xf32, #tpu.memory_space<vmem>>, %arg4: memref<24x1xf32, #tpu.memory_space<vmem>>, %arg5: memref<1x16x128xf32, #tpu.memory_space<vmem>>, %arg6: memref<1x8x128xf32, #tpu.memory_space<vmem>>) attributes {dimension_semantics = [#tpu.dimension_semantics<parallel>, #tpu.dimension_semantics<parallel>], iteration_bounds = array<i64: 2, 2>, scalar_prefetch = 0 : i64, scratch_operands = 0 : i64, tpu.core_type = #tpu.core_type<tc>, window_params = [{transform_indices = @transform_0, window_bounds = array<i64: 1, 4, 324>}, {pipeline_mode = #tpu.pipeline_mode<synchronous>, transform_indices = @transform_1, window_bounds = array<i64: 24, 128>}, {pipeline_mode = #tpu.pipeline_mode<synchronous>, transform_indices = @transform_2, window_bounds = array<i64: 24, 1>}, {transform_indices = @transform_3, window_bounds = array<i64: 1, 16, 128>}, {transform_indices = @transform_4, window_bounds = array<i64: 1, 8, 128>}]} {
    %c128_i32 = arith.constant 128 : i32
    %0 = arith.muli %arg1, %c128_i32 : i32
    %1 = tpu.assume_multiple %0, 128 : i32
    %c0 = arith.constant 0 : index
    %c0_0 = arith.constant 0 : index
    %2 = arith.index_cast %1 : i32 to index
    %3 = vector.load %arg2[%c0, %c0_0, %2] : memref<1x4x324xf32, #tpu.memory_space<vmem>>, vector<1x4x196xf32>
    %4 = vector.shape_cast %3 : vector<1x4x196xf32> to vector<4x196xf32>
    %5 = tpu.iota {dimensions = array<i32: 1>} : vector<1x128xi32>
    %c16_i32 = arith.constant 16 : i32
    %c0_i32 = arith.constant 0 : i32
    %6 = arith.cmpi eq, %c16_i32, %c0_i32 : i32
    %c1_i32 = arith.constant 1 : i32
    %7 = arith.select %6, %c1_i32, %c16_i32 : i32
    %8 = vector.broadcast %7 : i32 to vector<1x128xi32>
    %9 = arith.remsi %5, %8 : vector<1x128xi32>
    %c0_i32_1 = arith.constant 0 : i32
    %10 = vector.broadcast %c0_i32_1 : i32 to vector<1x128xi32>
    %11 = arith.cmpi ne, %9, %10 : vector<1x128xi32>
    %c0_i32_2 = arith.constant 0 : i32
    %12 = vector.broadcast %c0_i32_2 : i32 to vector<1x128xi32>
    %13 = arith.cmpi slt, %9, %12 : vector<1x128xi32>
    %c0_i32_3 = arith.constant 0 : i32
    %14 = arith.cmpi slt, %7, %c0_i32_3 : i32
    %15 = vector.broadcast %14 : i1 to vector<1x128xi1>
    %16 = vector.broadcast %15 : vector<1x128xi1> to vector<1x128xi1>
    %17 = arith.xori %13, %16 : vector<1x128xi1>
    %18 = arith.andi %17, %11 : vector<1x128xi1>
    %19 = vector.broadcast %7 : i32 to vector<1x128xi32>
    %20 = arith.addi %9, %19 : vector<1x128xi32>
    %21 = arith.select %18, %20, %9 : vector<1x128xi1>, vector<1x128xi32>
    %c2_i32 = arith.constant 2 : i32
    %22 = vector.broadcast %c2_i32 : i32 to vector<1x128xi32>
    %23 = arith.cmpi sge, %21, %22 : vector<1x128xi32>
    %c17_i32 = arith.constant 17 : i32
    %24 = vector.broadcast %c17_i32 : i32 to vector<1x128xi32>
    %25 = arith.cmpi sle, %21, %24 : vector<1x128xi32>
    %26 = arith.andi %23, %25 : vector<1x128xi1>
    %27 = arith.extui %26 : vector<1x128xi1> to vector<1x128xi32>
    %28 = arith.sitofp %27 : vector<1x128xi32> to vector<1x128xf32>
    %c1_i32_4 = arith.constant 1 : i32
    %29 = vector.broadcast %c1_i32_4 : i32 to vector<1x128xi32>
    %30 = arith.cmpi sge, %21, %29 : vector<1x128xi32>
    %c16_i32_5 = arith.constant 16 : i32
    %31 = vector.broadcast %c16_i32_5 : i32 to vector<1x128xi32>
    %32 = arith.cmpi sle, %21, %31 : vector<1x128xi32>
    %33 = arith.andi %30, %32 : vector<1x128xi1>
    %34 = arith.extui %33 : vector<1x128xi1> to vector<1x128xi32>
    %35 = arith.sitofp %34 : vector<1x128xi32> to vector<1x128xf32>
    %c-1_i32 = arith.constant -1 : i32
    %36 = vector.broadcast %c-1_i32 : i32 to vector<1x128xi32>
    %37 = arith.cmpi sge, %21, %36 : vector<1x128xi32>
    %c14_i32 = arith.constant 14 : i32
    %38 = vector.broadcast %c14_i32 : i32 to vector<1x128xi32>
    %39 = arith.cmpi sle, %21, %38 : vector<1x128xi32>
    %40 = arith.andi %37, %39 : vector<1x128xi1>
    %41 = arith.extui %40 : vector<1x128xi1> to vector<1x128xi32>
    %42 = arith.sitofp %41 : vector<1x128xi32> to vector<1x128xf32>
    %c-2_i32 = arith.constant -2 : i32
    %43 = vector.broadcast %c-2_i32 : i32 to vector<1x128xi32>
    %44 = arith.cmpi sge, %21, %43 : vector<1x128xi32>
    %c13_i32 = arith.constant 13 : i32
    %45 = vector.broadcast %c13_i32 : i32 to vector<1x128xi32>
    %46 = arith.cmpi sle, %21, %45 : vector<1x128xi32>
    %47 = arith.andi %44, %46 : vector<1x128xi1>
    %48 = arith.extui %47 : vector<1x128xi1> to vector<1x128xi32>
    %49 = arith.sitofp %48 : vector<1x128xi32> to vector<1x128xf32>
    %50 = vector.extract_strided_slice %4 {offsets = [0, 0], sizes = [4, 128], strides = [1, 1]} : vector<4x196xf32> to vector<4x128xf32>
    %51 = vector.broadcast %28 : vector<1x128xf32> to vector<4x128xf32>
    %52 = arith.mulf %50, %51 : vector<4x128xf32>
    %53 = vector.extract_strided_slice %4 {offsets = [0, 1], sizes = [4, 128], strides = [1, 1]} : vector<4x196xf32> to vector<4x128xf32>
    %54 = vector.broadcast %35 : vector<1x128xf32> to vector<4x128xf32>
    %55 = arith.mulf %53, %54 : vector<4x128xf32>
    %56 = vector.extract_strided_slice %4 {offsets = [0, 2], sizes = [4, 128], strides = [1, 1]} : vector<4x196xf32> to vector<4x128xf32>
    %57 = vector.extract_strided_slice %4 {offsets = [0, 3], sizes = [4, 128], strides = [1, 1]} : vector<4x196xf32> to vector<4x128xf32>
    %58 = vector.broadcast %42 : vector<1x128xf32> to vector<4x128xf32>
    %59 = arith.mulf %57, %58 : vector<4x128xf32>
    %60 = vector.extract_strided_slice %4 {offsets = [0, 4], sizes = [4, 128], strides = [1, 1]} : vector<4x196xf32> to vector<4x128xf32>
    %61 = vector.broadcast %49 : vector<1x128xf32> to vector<4x128xf32>
    %62 = arith.mulf %60, %61 : vector<4x128xf32>
    %63 = vector.extract_strided_slice %4 {offsets = [0, 16], sizes = [4, 128], strides = [1, 1]} : vector<4x196xf32> to vector<4x128xf32>
    %64 = vector.broadcast %28 : vector<1x128xf32> to vector<4x128xf32>
    %65 = arith.mulf %63, %64 : vector<4x128xf32>
    %66 = vector.extract_strided_slice %4 {offsets = [0, 17], sizes = [4, 128], strides = [1, 1]} : vector<4x196xf32> to vector<4x128xf32>
    %67 = vector.broadcast %35 : vector<1x128xf32> to vector<4x128xf32>
    %68 = arith.mulf %66, %67 : vector<4x128xf32>
    %69 = vector.extract_strided_slice %4 {offsets = [0, 18], sizes = [4, 128], strides = [1, 1]} : vector<4x196xf32> to vector<4x128xf32>
    %70 = vector.extract_strided_slice %4 {offsets = [0, 19], sizes = [4, 128], strides = [1, 1]} : vector<4x196xf32> to vector<4x128xf32>
    %71 = vector.broadcast %42 : vector<1x128xf32> to vector<4x128xf32>
    %72 = arith.mulf %70, %71 : vector<4x128xf32>
    %73 = vector.extract_strided_slice %4 {offsets = [0, 20], sizes = [4, 128], strides = [1, 1]} : vector<4x196xf32> to vector<4x128xf32>
    %74 = vector.broadcast %49 : vector<1x128xf32> to vector<4x128xf32>
    %75 = arith.mulf %73, %74 : vector<4x128xf32>
    %76 = vector.extract_strided_slice %4 {offsets = [0, 32], sizes = [4, 128], strides = [1, 1]} : vector<4x196xf32> to vector<4x128xf32>
    %77 = vector.broadcast %28 : vector<1x128xf32> to vector<4x128xf32>
    %78 = arith.mulf %76, %77 : vector<4x128xf32>
    %79 = vector.extract_strided_slice %4 {offsets = [0, 33], sizes = [4, 128], strides = [1, 1]} : vector<4x196xf32> to vector<4x128xf32>
    %80 = vector.broadcast %35 : vector<1x128xf32> to vector<4x128xf32>
    %81 = arith.mulf %79, %80 : vector<4x128xf32>
    %82 = vector.extract_strided_slice %4 {offsets = [0, 34], sizes = [4, 128], strides = [1, 1]} : vector<4x196xf32> to vector<4x128xf32>
    %83 = vector.extract_strided_slice %4 {offsets = [0, 35], sizes = [4, 128], strides = [1, 1]} : vector<4x196xf32> to vector<4x128xf32>
    %84 = vector.broadcast %42 : vector<1x128xf32> to vector<4x128xf32>
    %85 = arith.mulf %83, %84 : vector<4x128xf32>
    %86 = vector.extract_strided_slice %4 {offsets = [0, 36], sizes = [4, 128], strides = [1, 1]} : vector<4x196xf32> to vector<4x128xf32>
    %87 = vector.broadcast %49 : vector<1x128xf32> to vector<4x128xf32>
    %88 = arith.mulf %86, %87 : vector<4x128xf32>
    %89 = vector.extract_strided_slice %4 {offsets = [0, 48], sizes = [4, 128], strides = [1, 1]} : vector<4x196xf32> to vector<4x128xf32>
    %90 = vector.broadcast %28 : vector<1x128xf32> to vector<4x128xf32>
    %91 = arith.mulf %89, %90 : vector<4x128xf32>
    %92 = vector.extract_strided_slice %4 {offsets = [0, 49], sizes = [4, 128], strides = [1, 1]} : vector<4x196xf32> to vector<4x128xf32>
    %93 = vector.broadcast %35 : vector<1x128xf32> to vector<4x128xf32>
    %94 = arith.mulf %92, %93 : vector<4x128xf32>
    %95 = vector.extract_strided_slice %4 {offsets = [0, 50], sizes = [4, 128], strides = [1, 1]} : vector<4x196xf32> to vector<4x128xf32>
    %96 = vector.extract_strided_slice %4 {offsets = [0, 51], sizes = [4, 128], strides = [1, 1]} : vector<4x196xf32> to vector<4x128xf32>
    %97 = vector.broadcast %42 : vector<1x128xf32> to vector<4x128xf32>
    %98 = arith.mulf %96, %97 : vector<4x128xf32>
    %99 = vector.extract_strided_slice %4 {offsets = [0, 52], sizes = [4, 128], strides = [1, 1]} : vector<4x196xf32> to vector<4x128xf32>
    %100 = vector.broadcast %49 : vector<1x128xf32> to vector<4x128xf32>
    %101 = arith.mulf %99, %100 : vector<4x128xf32>
    %102 = vector.extract_strided_slice %4 {offsets = [0, 64], sizes = [4, 128], strides = [1, 1]} : vector<4x196xf32> to vector<4x128xf32>
    %103 = vector.broadcast %28 : vector<1x128xf32> to vector<4x128xf32>
    %104 = arith.mulf %102, %103 : vector<4x128xf32>
    %105 = vector.extract_strided_slice %4 {offsets = [0, 65], sizes = [4, 128], strides = [1, 1]} : vector<4x196xf32> to vector<4x128xf32>
    %106 = vector.broadcast %35 : vector<1x128xf32> to vector<4x128xf32>
    %107 = arith.mulf %105, %106 : vector<4x128xf32>
    %108 = vector.extract_strided_slice %4 {offsets = [0, 66], sizes = [4, 128], strides = [1, 1]} : vector<4x196xf32> to vector<4x128xf32>
    %109 = vector.extract_strided_slice %4 {offsets = [0, 67], sizes = [4, 128], strides = [1, 1]} : vector<4x196xf32> to vector<4x128xf32>
    %110 = vector.broadcast %42 : vector<1x128xf32> to vector<4x128xf32>
    %111 = arith.mulf %109, %110 : vector<4x128xf32>
    %112 = vector.extract_strided_slice %4 {offsets = [0, 68], sizes = [4, 128], strides = [1, 1]} : vector<4x196xf32> to vector<4x128xf32>
    %113 = vector.broadcast %49 : vector<1x128xf32> to vector<4x128xf32>
    %114 = arith.mulf %112, %113 : vector<4x128xf32>
    %cst = arith.constant 0.000000e+00 : f32
    %115 = vector.broadcast %cst : f32 to vector<28x128xf32>
    %116 = tpu.concatenate %52, %55, %56, %59, %62, %65, %68, %69, %72, %75, %78, %81, %82, %85, %88, %91 in 0 : vector<4x128xf32>, vector<4x128xf32>, vector<4x128xf32>, vector<4x128xf32>, vector<4x128xf32>, vector<4x128xf32>, vector<4x128xf32>, vector<4x128xf32>, vector<4x128xf32>, vector<4x128xf32>, vector<4x128xf32>, vector<4x128xf32>, vector<4x128xf32>, vector<4x128xf32>, vector<4x128xf32>, vector<4x128xf32> -> vector<64x128xf32>
    %117 = tpu.concatenate %94, %95, %98, %101, %104, %107, %108, %111, %114, %115 in 0 : vector<4x128xf32>, vector<4x128xf32>, vector<4x128xf32>, vector<4x128xf32>, vector<4x128xf32>, vector<4x128xf32>, vector<4x128xf32>, vector<4x128xf32>, vector<4x128xf32>, vector<28x128xf32> -> vector<64x128xf32>
    %118 = tpu.concatenate %116, %117 in 0 : vector<64x128xf32>, vector<64x128xf32> -> vector<128x128xf32>
    %c0_6 = arith.constant 0 : index
    %c0_7 = arith.constant 0 : index
    %119 = vector.load %arg3[%c0_6, %c0_7] : memref<24x128xf32, #tpu.memory_space<vmem>>, vector<24x128xf32>
    %cst_8 = arith.constant dense<0.000000e+00> : vector<24x128xf32>
    %120 = tpu.matmul %119, %118, %cst_8 {dimension_numbers = #tpu.dot_dimension_numbers<[1], [0], [0], [1], [0, 0, 1, 1], [], []>} : vector<24x128xf32>, vector<128x128xf32>, vector<24x128xf32> -> vector<24x128xf32>
    %c0_9 = arith.constant 0 : index
    %c0_10 = arith.constant 0 : index
    %121 = vector.load %arg4[%c0_9, %c0_10] : memref<24x1xf32, #tpu.memory_space<vmem>>, vector<24x1xf32>
    %122 = vector.broadcast %121 : vector<24x1xf32> to vector<24x128xf32>
    %123 = arith.addf %120, %122 : vector<24x128xf32>
    %124 = vector.extract_strided_slice %123 {offsets = [0, 0], sizes = [16, 128], strides = [1, 1]} : vector<24x128xf32> to vector<16x128xf32>
    %c0_11 = arith.constant 0 : index
    %c0_12 = arith.constant 0 : index
    %c0_13 = arith.constant 0 : index
    %125 = vector.load %arg5[%c0_11, %c0_12, %c0_13] : memref<1x16x128xf32, #tpu.memory_space<vmem>>, vector<1x16x128xf32>
    %126 = vector.shape_cast %125 : vector<1x16x128xf32> to vector<16x128xf32>
    %127 = vector.shape_cast %124 : vector<16x128xf32> to vector<1x16x128xf32>
    tpu.vector_store %arg5[%c0_11, %c0_12, %c0_13], %127 {strides = array<i32>} : memref<1x16x128xf32, #tpu.memory_space<vmem>>, vector<1x16x128xf32>,
    %128 = vector.extract_strided_slice %123 {offsets = [16, 0], sizes = [8, 128], strides = [1, 1]} : vector<24x128xf32> to vector<8x128xf32>
    %c0_14 = arith.constant 0 : index
    %c0_15 = arith.constant 0 : index
    %c0_16 = arith.constant 0 : index
    %129 = vector.load %arg6[%c0_14, %c0_15, %c0_16] : memref<1x8x128xf32, #tpu.memory_space<vmem>>, vector<1x8x128xf32>
    %130 = vector.shape_cast %129 : vector<1x8x128xf32> to vector<8x128xf32>
    %131 = vector.shape_cast %128 : vector<8x128xf32> to vector<1x8x128xf32>
    tpu.vector_store %arg6[%c0_14, %c0_15, %c0_16], %131 {strides = array<i32>} : memref<1x8x128xf32, #tpu.memory_space<vmem>>, vector<1x8x128xf32>,
    return
  }
  func.func @transform_0(%arg0: i32, %arg1: i32) -> (i32, i32, i32) {
    %c0_i32 = arith.constant 0 : i32
    %c0_i32_0 = arith.constant 0 : i32
    %c0_i32_1 = arith.constant 0 : i32
    return %arg0, %c0_i32, %c0_i32_0 : i32, i32, i32
  }
  func.func @transform_1(%arg0: i32, %arg1: i32) -> (i32, i32) {
    %c0_i32 = arith.constant 0 : i32
    %c0_i32_0 = arith.constant 0 : i32
    %c0_i32_1 = arith.constant 0 : i32
    return %c0_i32, %c0_i32_0 : i32, i32
  }
  func.func @transform_2(%arg0: i32, %arg1: i32) -> (i32, i32) {
    %c0_i32 = arith.constant 0 : i32
    %c0_i32_0 = arith.constant 0 : i32
    %c0_i32_1 = arith.constant 0 : i32
    return %c0_i32, %c0_i32_0 : i32, i32
  }
  func.func @transform_3(%arg0: i32, %arg1: i32) -> (i32, i32, i32) {
    %c0_i32 = arith.constant 0 : i32
    %c0_i32_0 = arith.constant 0 : i32
    return %arg0, %c0_i32, %arg1 : i32, i32, i32
  }
  func.func @transform_4(%arg0: i32, %arg1: i32) -> (i32, i32, i32) {
    %c0_i32 = arith.constant 0 : i32
    %c0_i32_0 = arith.constant 0 : i32
    return %arg0, %c0_i32, %arg1 : i32, i32, i32
  }
}

</mosaic_0001>

<bundles_post_ra>
// kernel: illumination_estimator.1
= control target key start
LH: loop header
LB: loop body
LE: loop exit
PB: predicated region body
PF: predicated region fallthrough
CT: control target
= control target key end

     0   :  { %s1270_s15 = smov 0   ;;  %s1272_s16 = smov 0   ;;  %s1634_s0 = inlined_call_operand.vmem [shape: f32[2,4,324], index: 0, kind: input, shape index: {}]   ;;  %s1635_s1 = inlined_call_operand.vmem [shape: f32[24,128], index: 1, kind: input, shape index: {}]   ;;  %s1636_s2 = inlined_call_operand.vmem [shape: f32[24,1], index: 2, kind: input, shape index: {}]   ;;  %s1637_s3 = inlined_call_operand.vmem [shape: f32[2,16,256], index: 3, kind: output, shape index: {0}]   ;;  %s1638_s4 = inlined_call_operand.vmem [shape: f32[2,8,256], index: 4, kind: output, shape index: {1}]  }
   0x1   :  { %s1274_s17 = smov 0   ;;  %s1276_s18 = smov 0  }
   0x2   :  { %s1278_s19 = smov 0   ;;  %s1280_s20 = smov 0  }
   0x3   :  { %s1282_s21 = smov 0  }
   0x4 LB: > { %s24_s22 = sadd.s32 1, %s1196_s19  ;;  %s27_s23 = sadd.s32 1, %s1200_s20  ;;  %s1204_s21 = sphi %s1282_s21, %s15_s21   ;;  %s1200_s20 = sphi %s1280_s20, %s1647_s20   ;;  %s1196_s19 = sphi %s1278_s19, %s1646_s19   ;;  %s1192_s18 = sphi %s1276_s18, %s1645_s18   ;;  %s1188_s17 = sphi %s1274_s17, %s1644_s17   ;;  %s1184_s16 = sphi %s1272_s16, %s1643_s16   ;;  %s1180_s15 = sphi %s1270_s15, %s1642_s15  }
   0x5   : > { %p25_p0 = scmp.ge.s32.totalorder %s24_s22, 2  ;;  %s938_s24 = sadd.s32 4294967295, %s1204_s21  }
   0x6   : > { %p114_p1 = scmp.ne.s32.totalorder %s1184_s16, %s1180_s15  ;;  %p115_p2 = scmp.eq.s32.totalorder %s938_s24, 3 }
   0x7   : > { %s1649_s22 = smov (%p25_p0, %s24_s22), 0  ;;  %s1651_s23 = smov (!%p25_p0, %s27_s23), %s1200_s20 }
   0x8   : > { %s100_s25 = ssub.s32 %s1196_s19, %s1649_s22  ;;  %p29_p3 = scmp.ge.s32.totalorder %s1651_s23, 2 }
   0x9   : > { %p942_p4 = scmp.ge.s32.totalorder %s1204_s21, 1  ;;  %p1316_p5 = por %p115_p2, %p114_p1 }
   0xa   : > { %p181_p6 = scmp.lt.s32.totalorder %s1204_s21, 5  ;;  %s1653_s23 = smov (%p29_p3, %s1651_s23), 0 }
   0xb   : > { %s99_s27 = ssub.s32 %s1200_s20, %s1653_s23  ;;  %s104_s29 = sadd.s32 1, %s1184_s16 }
   0xc   : > { %p182_p7 = pnand %p942_p4, %p181_p6  ;;  %s101_s28 = sor.u32 %s100_s25, %s99_s27 }
   0xd   : > { %p102_p8 = scmp.eq.s32.totalorder %s101_s28, 0  ;;  %p214_p9 = scmp.lt.s32.totalorder (!%p182_p7), %s1192_s18, 1 }
   0xe   : > { %185 = sbr.rel (%p182_p7) target bundleno = 630 (0x276), region = 32  ;;  %s947_s5 = sshll.u32 (!%p182_p7), %s1188_s17, 7 }
   0xf   : > { %s1327_s30 = scalar_select %p102_p8, %s1184_s16, %s104_s29  }
  0x10   : > { %s1207_s8 = smov (!%p182_p7), 68   ;;  %s1208_s9 = smov (!%p182_p7), 64  }
  0x11   : > { %s228_s10 = sshra.s32 (!%p182_p7), %s947_s5, 7  ;;  %s1209_s24 = smov (!%p182_p7), 67  }
  0x12   : > { %s948_s14 = sshll.u32 (!%p182_p7), %s228_s10, 2  ;;  %s1210_s25 = smov (!%p182_p7), 65  }
  0x13   : > { %v233_v0 = vlaneseq  ;;  %v1206_v1 = vmov 0.0   ;;  %s1334_s6 = scalar_select %p214_p9, %s1192_s18, 1  ;;  %vm401_vm4 = vcmask 556032   ;;  %vm380_vm5 = vcmask 523264  }
  0x14   : > { %977 = vmatprep.subr.mxu0 %v1206_v1  ;;  %1018 = vmatprep.subr.mxu1 %v1206_v1  ;;  %s1211_s28 = smov 52   ;;  %s1212_s29 = smov 51   ;;  %vm394_vm6 = vcmask 547840   ;;  %vm387_vm7 = vcmask 531456   ;;  %vm373_vm8 = vcmask 424960   ;;  %vm366_vm9 = vcmask 416768  }
  0x15   : > { %v234_v2 = vand.u32 127, %v233_v0  ;;  %s1050_s7 = smul.u32 12, %s1334_s6  ;;  %s1213_s5 = smov 49   ;;  %vm359_vm10 = vcmask 400384   ;;  %vm352_vm11 = vcmask 392192   ;;  %vm345_vm12 = vcmask 293888  }
  0x16   : > { %s1217_s10 = smov 35   ;;  %s1218_s11 = smov 33   ;;  %vm411_vm13 = vcmask 1039360   ;;  %vm537_vm14 = vcmask 1043456   ;;  %vm338_vm15 = vcmask 285696  }
  0x17   : > { %v239_v3 = vand.u32 15, %v234_v2  ;;  %s218_s13 = scalar_lea.vmem %s1634_s0, %s1050_s7  ;;  %s1215_s7 = smov 36  }
  0x18   : > { %s231_s27 = scalar_lea.vmem %s218_s13, %s948_s14  ;;  %s1219_s12 = smov 32  }
  0x19   : > { %vm263_vm0 = vcmp.le.s32.totalorder %v239_v3, 13  ;;  %vm247_vm1 = vcmp.ge.s32.totalorder %v239_v3, 2  ;;  %vm258_vm2 = vcmp.le.s32.totalorder %v239_v3, 14  ;;  %vm252_vm3 = vcmp.ge.s32.totalorder %v239_v3, 1  ;;  %v1347_v8 = vld [vmem:[%s231_s27] sm:$0xff]  ;;  %s1220_s13 = smov 127  }
  0x1a   : > { %v952_v4 = vsel %vm263_vm0, 1.0, %v1206_v1  ;;  %v1338_v5 = vsel %vm247_vm1, 1.0, %v1206_v1  ;;  %v951_v6 = vsel %vm258_vm2, 1.0, %v1206_v1  ;;  %v950_v7 = vsel %vm252_vm3, 1.0, %v1206_v1  ;;  %s1221_s14 = smov 20   ;;  %s1224_s27 = smov 4  }
  0x1b   : > { %398 = vrot.lane.b32.xlu0 %v952_v4, %s1207_s8  ;;  %377 = vrot.lane.b32.xlu1 %v1338_v5, %s1208_s9  ;;  %s1214_s8 = smov 111   ;;  %v1353_v9 = vcombine.high %v1347_v8, %v1347_v8  ;;  %s1216_s9 = smov 48   ;;  %v1361_v10 = vcombine.low %v1347_v8, %v1347_v8  ;;  %vm324_vm0 = vcmask 261120   ;;  %vm331_vm1 = vcmask 269312  }
  0x1c   : > { %vm310_vm2 = vcmask 154624   ;;  %vm317_vm3 = vcmask 162816   ;;  %p221_p10 = scmp.lt.s32.totalorder %s1188_s17, 1 }
  0x1f   : > { %391 = vrot.lane.b32.xlu0 %v951_v6, %s1209_s24  ;;  %384 = vrot.lane.b32.xlu1 %v950_v7, %s1210_s25  ;;  %s1222_s24 = smov 19   ;;  %s1223_s25 = smov 17  }
  0x23   : > { %370 = vrot.lane.b32.xlu1 %v952_v4, %s1211_s28  ;;  %363 = vrot.lane.b32.xlu0 %v951_v6, %s1212_s29  ;;  %s1225_s28 = smov 3   ;;  %s1226_s29 = smov 16  }
  0x27   : > { %356 = vrot.lane.b32.xlu0 %v950_v7, %s1213_s5  ;;  %593 = vrot.lane.b32.xlu1 %v1347_v8, %s1214_s8  ;;  %s1227_s5 = smov 79  }
  0x2b   : > { %595 = vrot.lane.b32.xlu0 %v1353_v9, %s1214_s8  ;;  %342 = vrot.lane.b32.xlu1 %v952_v4, %s1215_s7  ;;  %s1228_s7 = smov 1  }
  0x2f   : > { %349 = vrot.lane.b32.xlu0 %v1338_v5, %s1216_s9  ;;  %335 = vrot.lane.b32.xlu1 %v951_v6, %s1217_s10  ;;  %s1229_s9 = smov 109   ;;  %s1230_s10 = smov 113  }
  0x33   : > { %328 = vrot.lane.b32.xlu1 %v950_v7, %s1218_s11  ;;  %321 = vrot.lane.b32.xlu0 %v1338_v5, %s1219_s12  ;;  %s1231_s11 = smov 110   ;;  %s1232_s12 = smov 112  }
  0x37   : > { %551 = vrot.lane.b32.xlu1 %v1347_v8, %s1220_s13  ;;  %549 = vrot.lane.b32.xlu0 %v1361_v10, %s1220_s13 }
  0x3b   : > { %314 = vrot.lane.b32.xlu1 %v952_v4, %s1221_s14  ;;  %307 = vrot.lane.b32.xlu0 %v951_v6, %s1222_s24  ;;  %s1233_s14 = smov 125   ;;  %s1234_s24 = smov 126  }
  0x3f   : > { %300 = vrot.lane.b32.xlu0 %v950_v7, %s1223_s25  ;;  %285 = vrot.lane.b32.xlu1 %v952_v4, %s1224_s27  ;;  %s1235_s25 = smov 80   ;;  %s1236_s27 = smov 92  }
  0x43   : > { %277 = vrot.lane.b32.xlu1 %v951_v6, %s1225_s28  ;;  %293 = vrot.lane.b32.xlu0 %v1338_v5, %s1226_s29  ;;  %s1237_s28 = smov 94   ;;  %s1238_s29 = smov 93  }
  0x47   : > { %659 = vrot.lane.b32.xlu1 %v1206_v1, %s1227_s5  ;;  %269 = vrot.lane.b32.xlu0 %v950_v7, %s1228_s7  ;;  %s1239_s7 = smov 96  }
  0x8d   : > { %v399_v11 = vpop.permute.xlu0 %398  ;;  %v378_v12 = vpop.permute.xlu1 %377 }
  0x8e   : > { %v400_v13 = vrot.slane %v399_v11, 4  ;;  %v379_v14 = vrot.slane %v378_v12, 4 }
  0x90   : > { %v402_v15 = vsel %vm401_vm4, %v400_v13, %v399_v11  ;;  %v381_v16 = vsel %vm380_vm5, %v379_v14, %v378_v12  ;;  %vm303_vm4 = vcmask 138240   ;;  %vm473_vm5 = vcmask 891904  }
  0x91   : > { %v404_v17 = vmul.f32 %v402_v15, %v1347_v8  ;;  %v383_v18 = vmul.f32 %v381_v16, %v1347_v8  ;;  %v392_v19 = vpop.permute.xlu0 %391  ;;  %v385_v20 = vpop.permute.xlu1 %384 }
  0x92   : > { %v393_v21 = vrot.slane %v392_v19, 4  ;;  %v386_v22 = vrot.slane %v385_v20, 4 }
  0x93   : > { %611 = vrot.lane.b32.xlu0 %v404_v17, %s1229_s9  ;;  %576 = vrot.lane.b32.xlu1 %v383_v18, %s1230_s10  ;;  %v610_v37 = vcombine.high %v404_v17, %v404_v17  ;;  %v575_v42 = vcombine.high %v383_v18, %v383_v18 }
  0x94   : > { %v395_v23 = vsel %vm394_vm6, %v393_v21, %v392_v19  ;;  %v388_v27 = vsel %vm387_vm7, %v386_v22, %v385_v20  ;;  %vm456_vm6 = vcmask 908288   ;;  %vm464_vm7 = vcmask 900096  }
  0x95   : > { %v397_v24 = vmul.f32 %v395_v23, %v1347_v8  ;;  %v371_v25 = vpop.permute.xlu1 %370  ;;  %v364_v26 = vpop.permute.xlu0 %363  ;;  %v390_v32 = vmul.f32 %v388_v27, %v1347_v8 }
  0x96   : > { %v372_v28 = vrot.slane %v371_v25, 4  ;;  %v365_v29 = vrot.slane %v364_v26, 4 }
  0x97   : > { %604 = vrot.lane.b32.xlu0 %v397_v24, %s1231_s11  ;;  %v601_v41 = vcombine.low %v397_v24, %v397_v24  ;;  %v585_v47 = vcombine.low %v390_v32, %v390_v32 }
  0x98   : > { %v374_v30 = vsel %vm373_vm8, %v372_v28, %v371_v25  ;;  %v367_v31 = vsel %vm366_vm9, %v365_v29, %v364_v26  ;;  %vm288_vm8 = vcmask 31744   ;;  %vm580_vm9 = vcmask 924672  }
  0x99   : > { %v376_v33 = vmul.f32 %v374_v30, %v1347_v8  ;;  %v357_v34 = vpop.permute.xlu0 %356  ;;  %v1378_v35 = vpop.permute.xlu1 %593  ;;  %v369_v36 = vmul.f32 %v367_v31, %v1347_v8 }
  0x9a   : > { %v358_v40 = vrot.slane %v357_v34, 4 }
  0x9b   : > { %588 = vrot.lane.b32.xlu0 %v390_v32, %s1232_s12  ;;  %569 = vrot.lane.b32.xlu1 %v376_v33, %s1233_s14  ;;  %v566_v48 = vcombine.low %v376_v33, %v376_v33  ;;  %v557_v54 = vcombine.high %v369_v36, %v369_v36 }
  0x9c   : > { %v360_v45 = vsel %vm359_vm10, %v358_v40, %v357_v34  ;;  %vm447_vm10 = vcmask 916480  }
  0x9d   : > { %v1383_v38 = vpop.permute.xlu0 %595  ;;  %v343_v39 = vpop.permute.xlu1 %342  ;;  %v1390_v52 = vmul.f32 %v360_v45, %v1347_v8 }
  0x9e   : > { %v344_v49 = vrot.slane %v343_v39, 4 }
  0x9f   : > { %613 = vrot.lane.b32.xlu1 %v610_v37, %s1229_s9  ;;  %558 = vrot.lane.b32.xlu0 %v369_v36, %s1234_s24 }
  0xa0   : > { %v346_v55 = vsel %vm345_vm12, %v344_v49, %v343_v39  ;;  %vm420_vm12 = vcmask 1031168  }
  0xa1   : > { %v350_v43 = vpop.permute.xlu0 %349  ;;  %v336_v44 = vpop.permute.xlu1 %335  ;;  %v1405_v61 = vmul.f32 %v346_v55, %v1347_v8 }
  0xa2   : > { %v351_v46 = vrot.slane %v350_v43, 4  ;;  %v337_v62 = vrot.slane %v336_v44, 4 }
  0xa3   : > { %602 = vrot.lane.b32.xlu1 %v601_v41, %s1231_s11  ;;  %578 = vrot.lane.b32.xlu0 %v575_v42, %s1230_s10  ;;  %s1240_s10 = smov 95   ;;  %v520_v27 = vcombine.high %v1405_v61, %v1405_v61 }
  0xa4   : > { %v353_v53 = vsel %vm352_vm11, %v351_v46, %v350_v43  ;;  %v339_v3 = vsel %vm338_vm15, %v337_v62, %v336_v44  ;;  %vm429_vm11 = vcmask 1022976   ;;  %vm296_vm15 = vcmask 130048  }
  0xa5   : > { %v329_v50 = vpop.permute.xlu1 %328  ;;  %v322_v51 = vpop.permute.xlu0 %321  ;;  %v1400_v59 = vmul.f32 %v353_v53, %v1347_v8  ;;  %v341_v13 = vmul.f32 %v339_v3, %v1347_v8  ;;  %v597_v53 = vsel %vm456_vm6, %v1378_v35, %v1383_v38 }
  0xa6   : > { %v323_v63 = vrot.slane %v322_v51, 4  ;;  %v330_v4 = vrot.slane %v329_v50, 4 }
  0xa7   : > { %586 = vrot.lane.b32.xlu1 %v585_v47, %s1232_s12  ;;  %567 = vrot.lane.b32.xlu0 %v566_v48, %s1233_s14  ;;  %v529_v28 = vcombine.low %v1400_v59, %v1400_v59  ;;  %v511_v30 = vcombine.low %v341_v13, %v341_v13 }
  0xa8   : > { %v325_v6 = vsel %vm324_vm0, %v323_v63, %v322_v51  ;;  %v332_v14 = vsel %vm331_vm1, %v330_v4, %v329_v50  ;;  %vm280_vm0 = vcmask 23552   ;;  %vm272_vm1 = vcmask 7168  }
  0xa9   : > { %v1394_v56 = vpop.permute.xlu1 %551  ;;  %v550_v57 = vpop.permute.xlu0 %549  ;;  %v327_v15 = vmul.f32 %v325_v6, %v1347_v8  ;;  %v334_v20 = vmul.f32 %v332_v14, %v1347_v8 }
  0xaa   : > { %v553_v58 = vsel %vm411_vm13, %v550_v57, %v1394_v56 }
  0xab   : > { %560 = vrot.lane.b32.xlu1 %v557_v54, %s1234_s24  ;;  %v618_v60 = vsel %vm537_vm14, %v1390_v52, %v553_v58  ;;  %v486_v29 = vcombine.high %v327_v15, %v327_v15  ;;  %v495_v32 = vcombine.low %v334_v20, %v334_v20 }
  0xac   : > { %639 = vrot.lane.b32.xlu0 %v618_v60, %s1227_s5 }
  0xad   : > { %v315_v0 = vpop.permute.xlu1 %314  ;;  %v308_v2 = vpop.permute.xlu0 %307 }
  0xae   : > { %v309_v7 = vrot.slane %v308_v2, 4  ;;  %v316_v16 = vrot.slane %v315_v0, 4 }
  0xaf   : > { %532 = vrot.lane.b32.xlu1 %v1400_v59, %s1235_s25 }
  0xb0   : > { %521 = vrot.lane.b32.xlu0 %v1405_v61, %s1236_s27  ;;  %v311_v17 = vsel %vm310_vm2, %v309_v7, %v308_v2  ;;  %v318_v21 = vsel %vm317_vm3, %v316_v16, %v315_v0  ;;  %vm1639_vm2 = vmmov 0   ;;  %vm661_vm3 = vcmask 646144  }
  0xb1   : > { %v1412_v11 = vpop.permute.xlu1 %285  ;;  %v301_v12 = vpop.permute.xlu0 %300  ;;  %v313_v22 = vmul.f32 %v311_v17, %v1347_v8  ;;  %v320_v25 = vmul.f32 %v318_v21, %v1347_v8  ;;  %1012 = vmatprep.mubr.msk.f32.mxu1 %vm1639_vm2, %v1206_v1  ;;  %1009 = vmatprep.mubr.msk.f32.mxu0 %vm1639_vm2, %v1206_v1  ;;  %v1244_v21 = vmov 0   ;;  %vm482_vm2 = vcmask 883712  }
  0xb2   : > { %v302_v18 = vrot.slane %v301_v12, 4  ;;  %v287_v54 = vrot.slane %v1412_v11, 4  ;;  %1146 = vset.pattern.permute.xlu0 %v1244_v21  ;;  %1147 = vset.pattern.permute.xlu1 %v1244_v21 }
  0xb3   : > { %505 = vrot.lane.b32.xlu1 %v1353_v9, %s1237_s28  ;;  %v468_v31 = vcombine.high %v313_v22, %v313_v22  ;;  %v477_v34 = vcombine.low %v320_v25, %v320_v25 }
  0xb4   : > { %503 = vrot.lane.b32.xlu0 %v1347_v8, %s1237_s28  ;;  %v304_v23 = vsel %vm303_vm4, %v302_v18, %v301_v12  ;;  %s1241_s28 = smov 108   ;;  %v289_v59 = vsel %vm288_vm8, %v287_v54, %v1412_v11  ;;  %vm525_vm4 = vcmask 752640   ;;  %vm534_vm8 = vcmask 654336  }
  0xb5   : > { %v1418_v19 = vpop.permute.xlu1 %277  ;;  %v306_v26 = vmul.f32 %v304_v23, %v1347_v8  ;;  %v294_v37 = vpop.permute.xlu0 %293  ;;  %v291_v63 = vmul.f32 %v289_v59, %v1347_v8  ;;  %v676_v23 = vld [vmem:[%s1636_s2] sm:$0xff] }
  0xb7   : > { %514 = vrot.lane.b32.xlu1 %v341_v13, %s1238_s29  ;;  %v451_v33 = vcombine.high %v306_v26, %v306_v26  ;;  %v433_v11 = vcombine.high %v291_v63, %v291_v63  ;;  %v279_v13 = vrot.slane %v1418_v19, 4 }
  0xb8   : > { %487 = vrot.lane.b32.xlu0 %v327_v15, %s1239_s7 }
  0xb9   : > { %v660_v24 = vpop.permute.xlu1 %659  ;;  %v1455_v39 = vpop.permute.xlu0 %269  ;;  %v281_v15 = vsel %vm280_vm0, %v279_v13, %v1418_v19  ;;  %vm491_vm0 = vcmask 785408  }
  0xba   : > { %978 = vmatpush3.msra.mxu0 %v660_v24  ;;  %1034 = vmatpush3.msra.mxu1 %v660_v24  ;;  %v271_v16 = vrot.slane %v1455_v39, 4  ;;  %v283_v17 = vmul.f32 %v281_v15, %v1347_v8 }
  0xbb   : > { %498 = vrot.lane.b32.xlu1 %v334_v20, %s1240_s10  ;;  %979 = vmatprep.subr.mxu0 %v1206_v1 }
  0xbc   : > { %469 = vrot.lane.b32.xlu0 %v313_v22, %s1229_s9  ;;  %1019 = vmatprep.subr.mxu1 %v1206_v1  ;;  %v273_v18 = vsel %vm272_vm1, %v271_v16, %v1455_v39  ;;  %v424_v20 = vcombine.low %v283_v17, %v283_v17  ;;  %vm500_vm1 = vcmask 777216  }
  0xbd   : > { %980 = vmatpush3.msra.mxu0 %v660_v24  ;;  %1035 = vmatpush3.msra.mxu1 %v660_v24  ;;  %v275_v19 = vmul.f32 %v273_v18, %v1347_v8 }
  0xbe   : > { %981 = vmatprep.subr.mxu0 %v1206_v1  ;;  %1020 = vmatprep.subr.mxu1 %v1206_v1 }
  0xbf   : > { %480 = vrot.lane.b32.xlu1 %v320_v25, %s1241_s28  ;;  %982 = vmatpush3.msra.mxu0 %v660_v24  ;;  %v406_v22 = vcombine.low %v275_v19, %v275_v19 }
  0xc0   : > { %452 = vrot.lane.b32.xlu0 %v306_v26, %s1214_s8  ;;  %1036 = vmatpush3.msra.mxu1 %v660_v24  ;;  %v678_v24 = vld [vmem:[%s1636_s2 + $0x10] sm:$0xff] }
  0xc1   : > { %983 = vmatprep.subr.mxu0 %v1206_v1  ;;  %1021 = vmatprep.subr.mxu1 %v1206_v1 }
  0xc3   : > { %462 = vrot.lane.b32.xlu1 %v1347_v8, %s1231_s11 }
  0xc4   : > { %460 = vrot.lane.b32.xlu0 %v1361_v10, %s1231_s11  ;;  %v547_v10 = vcombine.high %v1390_v52, %v1390_v52 }
  0xc6   : > { %v619_v36 = vsel %vm537_vm14, %v547_v10, %v1394_v56 }
  0xc7   : > { %523 = vrot.lane.b32.xlu1 %v520_v27, %s1236_s27 }
  0xc8   : > { %530 = vrot.lane.b32.xlu0 %v529_v28, %s1235_s25 }
  0xcb   : > { %489 = vrot.lane.b32.xlu1 %v486_v29, %s1239_s7 }
  0xcc   : > { %512 = vrot.lane.b32.xlu0 %v511_v30, %s1238_s29 }
  0xcf   : > { %471 = vrot.lane.b32.xlu1 %v468_v31, %s1229_s9 }
  0xd0   : > { %496 = vrot.lane.b32.xlu0 %v495_v32, %s1240_s10 }
  0xd3   : > { %454 = vrot.lane.b32.xlu1 %v451_v33, %s1214_s8  ;;  %s1242_s8 = smov 124  }
  0xd4   : > { %478 = vrot.lane.b32.xlu0 %v477_v34, %s1241_s28  ;;  %s201_s28 = sand.u32 1, %s1180_s15  }
  0xd5   : > { %s943_s9 = sshll.u32 %s201_s28, 4 }
  0xd7   : > { %641 = vrot.lane.b32.xlu1 %v619_v36, %s1227_s5 }
 0x105   : > { %v612_v40 = vpop.permute.xlu0 %611  ;;  %v577_v41 = vpop.permute.xlu1 %576 }
 0x109   : > { %v605_v42 = vpop.permute.xlu0 %604 }
 0x10a   : > { %v625_v43 = vsel %vm537_vm14, %v1383_v38, %v605_v42  ;;  %v295_v38 = vrot.slane %v294_v37, 4 }
 0x10b   : > { %653 = vrot.lane.b32.xlu1 %v625_v43, %s1227_s5 }
 0x10c   : > { %v297_v6 = vsel %vm296_vm15, %v295_v38, %v294_v37  ;;  %vm516_vm15 = vcmask 760832  }
 0x10d   : > { %v589_v44 = vpop.permute.xlu0 %588  ;;  %v570_v45 = vpop.permute.xlu1 %569  ;;  %v299_v12 = vmul.f32 %v297_v6, %v1347_v8 }
 0x10f   : > { %v442_v14 = vcombine.low %v299_v12, %v299_v12 }
 0x111   : > { %v614_v46 = vpop.permute.xlu1 %613  ;;  %v559_v47 = vpop.permute.xlu0 %558 }
 0x112   : > { %v615_v48 = vsel %vm473_vm5, %v612_v40, %v614_v46  ;;  %v627_v49 = vsel %vm537_vm14, %v614_v46, 0.0 }
 0x113   : > { %657 = vrot.lane.b32.xlu1 %v627_v49, %s1227_s5  ;;  %v626_v50 = vsel %vm537_vm14, %v615_v48, 0.0 }
 0x114   : > { %655 = vrot.lane.b32.xlu0 %v626_v50, %s1227_s5 }
 0x115   : > { %v603_v51 = vpop.permute.xlu1 %602  ;;  %v579_v52 = vpop.permute.xlu0 %578 }
 0x116   : > { %v606_v55 = vsel %vm464_vm7, %v603_v51, %v605_v42  ;;  %v623_v56 = vsel %vm537_vm14, %v579_v52, %v589_v44  ;;  %v581_v60 = vsel %vm580_vm9, %v577_v41, %v579_v52  ;;  %vm507_vm9 = vcmask 769024  }
 0x117   : > { %649 = vrot.lane.b32.xlu1 %v623_v56, %s1227_s5  ;;  %v624_v57 = vsel %vm537_vm14, %v597_v53, %v606_v55 }
 0x118   : > { %651 = vrot.lane.b32.xlu0 %v624_v57, %s1227_s5 }
 0x119   : > { %v587_v58 = vpop.permute.xlu1 %586  ;;  %v568_v61 = vpop.permute.xlu0 %567 }
 0x11a   : > { %v590_v35 = vsel %vm447_vm10, %v587_v58, %v589_v44  ;;  %v571_v2 = vsel %vm429_vm11, %v568_v61, %v570_v45 }
 0x11b   : > { %v622_v62 = vsel %vm537_vm14, %v581_v60, %v590_v35 }
 0x11c   : > { %647 = vrot.lane.b32.xlu0 %v622_v62, %s1227_s5 }
 0x11d   : > { %v561_v0 = vpop.permute.xlu1 %560 }
 0x11e   : > { %v562_v3 = vsel %vm420_vm12, %v559_v47, %v561_v0  ;;  %v621_v4 = vsel %vm537_vm14, %v561_v0, %v570_v45  ;;  %v640_v27 = vpop.permute.xlu0 %639 }
 0x11f   : > { %645 = vrot.lane.b32.xlu1 %v621_v4, %s1227_s5  ;;  %v620_v7 = vsel %vm537_vm14, %v562_v3, %v571_v2 }
 0x120   : > { %643 = vrot.lane.b32.xlu0 %v620_v7, %s1227_s5  ;;  %s945_s5 = sshll.u32 %s1334_s6, 1  ;;  %s954_s6 = sshll.u32 (%p1316_p5), %s1192_s18, 2 }
 0x121   : > { %v533_v25 = vpop.permute.xlu1 %532 }
 0x122   : > { %v522_v29 = vpop.permute.xlu0 %521 }
 0x123   : > { %436 = vrot.lane.b32.xlu1 %v433_v11, %s1242_s8 }
 0x124   : > { %434 = vrot.lane.b32.xlu0 %v291_v63, %s1242_s8  ;;  %s222_s8 = scalar_select %p221_p10, %s1188_s17, 1 }
 0x125   : > { %v506_v26 = vpop.permute.xlu1 %505 }
 0x126   : > { %v504_v31 = vpop.permute.xlu0 %503  ;;  %s224_s11 = sadd.s32 %s945_s5, %s222_s8 }
 0x127   : > { %445 = vrot.lane.b32.xlu1 %v299_v12, %s1232_s12  ;;  %v508_v62 = vsel %vm507_vm9, %v504_v31, %v506_v26 }
 0x128   : > { %443 = vrot.lane.b32.xlu0 %v442_v14, %s1232_s12  ;;  %s946_s12 = sshll.u32 %s224_s11, 3 }
 0x129   : > { %v515_v28 = vpop.permute.xlu1 %514  ;;  %s226_s15 = scalar_lea.vmem %s1638_s4, %s946_s12 }
 0x12a   : > { %v1519_v33 = vpop.permute.xlu0 %487 }
 0x12b   : > { %418 = vrot.lane.b32.xlu1 %v1353_v9, %s1234_s24  ;;  %v677_v9 = vld [vmem:[%s1636_s2 + $0x8] sm:$0xff] }
 0x12c   : > { %416 = vrot.lane.b32.xlu0 %v1347_v8, %s1234_s24  ;;  %s203_s24 = scalar_lea.vmem [#allocation2], %s943_s9 }
 0x12d   : > { %v1515_v30 = vpop.permute.xlu1 %498 }
 0x12e   : > { %v1523_v34 = vpop.permute.xlu0 %469 }
 0x12f   : > { %427 = vrot.lane.b32.xlu1 %v283_v17, %s1233_s14 }
 0x130   : > { %425 = vrot.lane.b32.xlu0 %v424_v20, %s1233_s14  ;;  %s793_s14 = sadd.s32 (%p1316_p5), %s1188_s17, %s954_s6 }
 0x131   : > { %v1517_v32 = vpop.permute.xlu1 %480  ;;  %s955_s27 = sshll.u32 (%p1316_p5), %s793_s14, 3 }
 0x132   : > { %v1525_v37 = vpop.permute.xlu0 %452  ;;  %s795_s10 = scalar_lea.vmem (%p1316_p5), %s1637_s3, %s955_s27 }
 0x133   : > { %409 = vrot.lane.b32.xlu1 %v275_v19, %s1220_s13 }
 0x134   : > { %407 = vrot.lane.b32.xlu0 %v406_v22, %s1220_s13 }
 0x135   : > { %v1521_v10 = vpop.permute.xlu1 %462 }
 0x136   : > { %v1527_v40 = vpop.permute.xlu0 %460 }
 0x137   : > { %686 = vperm.xlu1 %1147, %v677_v9   ;;  %v465_v16 = vsel %vm464_vm7, %v1527_v40, %v1521_v10 }
 0x138   : > { %681 = vperm.xlu0 %1146, %v676_v23  }
 0x139   : > { %v524_v36 = vpop.permute.xlu1 %523 }
 0x13a   : > { %v531_v42 = vpop.permute.xlu0 %530  ;;  %v526_v60 = vsel %vm525_vm4, %v522_v29, %v524_v36 }
 0x13b   : > { %691 = vperm.xlu1 %1147, %v678_v24   ;;  %v535_v35 = vsel %vm534_vm8, %v531_v42, %v533_v25 }
 0x13c   : > { %v545_v2 = vsel %vm537_vm14, %v526_v60, %v535_v35 }
 0x13d   : > { %v490_v39 = vpop.permute.xlu1 %489 }
 0x13e   : > { %v513_v44 = vpop.permute.xlu0 %512  ;;  %v492_v3 = vsel %vm491_vm0, %v1519_v33, %v490_v39  ;;  %v675_v33 = vld [vmem:[%s1635_s1 + $0x10] sm:$0xff] }
 0x13f   : > { %v517_v63 = vsel %vm516_vm15, %v513_v44, %v515_v28  ;;  %v267_v28 = vmul.f32 %v1338_v5, %v1347_v8  ;;  %v673_v5 = vld [vmem:[%s1635_s1] sm:$0xff] }
 0x140   : > { %v544_v7 = vsel %vm537_vm14, %v508_v62, %v517_v63 }
 0x141   : > { %v1529_v41 = vpop.permute.xlu1 %471 }
 0x142   : > { %v497_v46 = vpop.permute.xlu0 %496  ;;  %v474_v11 = vsel %vm473_vm5, %v1523_v34, %v1529_v41  ;;  %vm438_vm5 = vcmask 1014784  }
 0x143   : > { %v501_v4 = vsel %vm500_vm1, %v497_v46, %v1515_v30 }
 0x144   : > { %v543_v14 = vsel %vm537_vm14, %v492_v3, %v501_v4 }
 0x145   : > { %v1531_v43 = vpop.permute.xlu1 %454 }
 0x146   : > { %v479_v48 = vpop.permute.xlu0 %478  ;;  %v457_v15 = vsel %vm456_vm6, %v1525_v37, %v1531_v43  ;;  %vm1641_vm6 = vmmov 0  }
 0x147   : > { %v483_v12 = vsel %vm482_vm2, %v479_v48, %v1517_v32  ;;  %v541_v21 = vsel %vm537_vm14, %v457_v15, %v465_v16  ;;  %v674_v32 = vld [vmem:[%s1635_s1 + $0x8] sm:$0xff] }
 0x148   : > { %v542_v18 = vsel %vm537_vm14, %v474_v11, %v483_v12 }
 0x149   : > { %v642_v45 = vpop.permute.xlu1 %641 }
 0x14a   : > { %v662_v61 = vsel %vm661_vm3, %v640_v27, %v642_v45 }
 0x17d   : > { %v654_v47 = vpop.permute.xlu1 %653 }
 0x185   : > { %v658_v49 = vpop.permute.xlu1 %657 }
 0x186   : > { %v656_v50 = vpop.permute.xlu0 %655 }
 0x187   : > { %v666_v51 = vsel %vm661_vm3, %v656_v50, %v658_v49 }
 0x188   : > { %984 = vmatpush3.msra.mxu0 %v666_v51  ;;  %1037 = vmatpush3.msra.mxu1 %v666_v51 }
 0x189   : > { %985 = vmatprep.subr.mxu0 %v1206_v1  ;;  %1022 = vmatprep.subr.mxu1 %v1206_v1  ;;  %v650_v54 = vpop.permute.xlu1 %649 }
 0x18a   : > { %v652_v52 = vpop.permute.xlu0 %651 }
 0x18b   : > { %v665_v53 = vsel %vm661_vm3, %v652_v52, %v654_v47 }
 0x18c   : > { %986 = vmatpush3.msra.mxu0 %v665_v53  ;;  %1038 = vmatpush3.msra.mxu1 %v665_v53 }
 0x18d   : > { %987 = vmatprep.subr.mxu0 %v1206_v1  ;;  %1023 = vmatprep.subr.mxu1 %v1206_v1 }
 0x18e   : > { %v648_v55 = vpop.permute.xlu0 %647 }
 0x18f   : > { %v664_v56 = vsel %vm661_vm3, %v648_v55, %v650_v54 }
 0x190   : > { %988 = vmatpush3.msra.mxu0 %v664_v56  ;;  %1039 = vmatpush3.msra.mxu1 %v664_v56 }
 0x191   : > { %v646_v57 = vpop.permute.xlu1 %645  ;;  %989 = vmatprep.subr.mxu0 %v1206_v1  ;;  %1024 = vmatprep.subr.mxu1 %v1206_v1 }
 0x192   : > { %v644_v58 = vpop.permute.xlu0 %643 }
 0x193   : > { %v663_v59 = vsel %vm661_vm3, %v644_v58, %v646_v57 }
 0x194   : > { %990 = vmatpush3.msra.mxu0 %v663_v59  ;;  %1040 = vmatpush3.msra.mxu1 %v663_v59 }
 0x195   : > { %991 = vmatprep.subr.mxu0 %v1206_v1  ;;  %1025 = vmatprep.subr.mxu1 %v1206_v1  ;;  %v437_v38 = vpop.permute.xlu1 %436 }
 0x196   : > { %v435_v0 = vpop.permute.xlu0 %434  ;;  %992 = vmatpush3.msra.mxu0 %v662_v61  ;;  %1041 = vmatpush3.msra.mxu1 %v662_v61 }
 0x197   : > { %993 = vmatprep.subr.mxu0 %v1206_v1  ;;  %1026 = vmatprep.subr.mxu1 %v1206_v1  ;;  %v439_v22 = vsel %vm438_vm5, %v435_v0, %v437_v38 }
 0x198   : > { %994 = vmatpush3.msra.mxu0 %v545_v2  ;;  %1042 = vmatpush3.msra.mxu1 %v545_v2 }
 0x199   : > { %995 = vmatprep.subr.mxu0 %v1206_v1  ;;  %1027 = vmatprep.subr.mxu1 %v1206_v1  ;;  %v446_v6 = vpop.permute.xlu1 %445 }
 0x19a   : > { %v444_v13 = vpop.permute.xlu0 %443  ;;  %996 = vmatpush3.msra.mxu0 %v544_v7  ;;  %1043 = vmatpush3.msra.mxu1 %v544_v7 }
 0x19b   : > { %997 = vmatprep.subr.mxu0 %v1206_v1  ;;  %1028 = vmatprep.subr.mxu1 %v1206_v1  ;;  %v448_v19 = vsel %vm447_vm10, %v444_v13, %v446_v6 }
 0x19c   : > { %998 = vmatpush3.msra.mxu0 %v543_v14  ;;  %1044 = vmatpush3.msra.mxu1 %v543_v14  ;;  %v540_v23 = vsel %vm537_vm14, %v439_v22, %v448_v19 }
 0x19d   : > { %999 = vmatprep.subr.mxu0 %v1206_v1  ;;  %1029 = vmatprep.subr.mxu1 %v1206_v1  ;;  %v419_v17 = vpop.permute.xlu1 %418 }
 0x19e   : > { %v417_v20 = vpop.permute.xlu0 %416  ;;  %1000 = vmatpush3.msra.mxu0 %v542_v18  ;;  %1045 = vmatpush3.msra.mxu1 %v542_v18 }
 0x19f   : > { %1001 = vmatprep.subr.mxu0 %v1206_v1  ;;  %1030 = vmatprep.subr.mxu1 %v1206_v1  ;;  %v421_v25 = vsel %vm420_vm12, %v417_v20, %v419_v17 }
 0x1a0   : > { %1002 = vmatpush3.msra.mxu0 %v541_v21  ;;  %1046 = vmatpush3.msra.mxu1 %v541_v21 }
 0x1a1   : > { %1003 = vmatprep.subr.mxu0 %v1206_v1  ;;  %1031 = vmatprep.subr.mxu1 %v1206_v1  ;;  %v428_v9 = vpop.permute.xlu1 %427 }
 0x1a2   : > { %v426_v24 = vpop.permute.xlu0 %425  ;;  %1004 = vmatpush3.msra.mxu0 %v540_v23  ;;  %1047 = vmatpush3.msra.mxu1 %v540_v23 }
 0x1a3   : > { %v430_v26 = vsel %vm429_vm11, %v426_v24, %v428_v9  ;;  %1005 = vmatprep.subr.mxu0 %v1206_v1  ;;  %1032 = vmatprep.subr.mxu1 %v1206_v1 }
 0x1a4   : > { %v539_v27 = vsel %vm537_vm14, %v421_v25, %v430_v26 }
 0x1a5   : > { %1006 = vmatpush3.msra.mxu0 %v539_v27  ;;  %1048 = vmatpush3.msra.mxu1 %v539_v27  ;;  %v410_v29 = vpop.permute.xlu1 %409 }
 0x1a6   : > { %v408_v30 = vpop.permute.xlu0 %407  ;;  %1007 = vmatprep.subr.mxu0 %v1206_v1  ;;  %1033 = vmatprep.subr.mxu1 %v1206_v1 }
 0x1a7   : > { %v412_v31 = vsel %vm411_vm13, %v408_v30, %v410_v29 }
 0x1a8   : > { %v538_v8 = vsel %vm537_vm14, %v267_v28, %v412_v31 }
 0x1a9   : > { %1008 = vmatpush3.msra.mxu0 %v538_v8  ;;  %1049 = vmatpush3.msra.mxu1 %v538_v8 }
 0x1aa   : > { %1013 = vmatmul.mubr.f32.vlgmr.msra.gmra.mxu1 %v674_v32  ;;  %1010 = vmatmul.mubr.f32.vlgmr.msra.gmra.mxu0 %v673_v5 }
 0x1ab   : > { %1015 = vmatprep.mubr.msk.f32.mxu1 %vm1641_vm6, %v1206_v1 }
 0x1ae   : > { %1016 = vmatmul.mubr.f32.gmra.mxu1 %v675_v33 }
 0x1b2   : > { %v687_v10 = vpop.permute.xlu1 %686 }
 0x1b3   : > { %v682_v34 = vpop.permute.xlu0 %681 }
 0x1b6   : > { %v692_v42 = vpop.permute.xlu1 %691 }
 0x26a   : > { %v765_v36 = vpop.f32.mrf.mxu1  ;;  %v760_v37 = vpop.f32.mrf.mxu0 }
 0x26b   : > { %v766_v39 = vadd.f32 %v765_v36, %v687_v10  ;;  %v761_v40 = vadd.f32 %v760_v37, %v682_v34 }
 0x26c   : > { %v1014_v41 = vpop.f32.mrf.mxu1  ;;  %v1011_v1 = vpop.f32.mrf.mxu0 }
 0x26d   : > { %775 = vst [vmem:[%s203_s24 + $0x8] sm:$0xff] %v766_v39  ;;  %774 = vst [vmem:[%s203_s24] sm:$0xff] %v761_v40  ;;  %791 = sbr.rel (!%p1316_p5) target bundleno = 630 (0x276), region = 36 }
 0x26e   : > { %v770_v43 = vpop.f32.mrf.mxu1 }
 0x26f   : > { %v771_v44 = vadd.f32 %v770_v43, %v692_v42 }
 0x270   : > { %v1017_v45 = vpop.f32.mrf.mxu1 }
 0x271   : > { %776 = vst [vmem:[%s226_s15] sm:$0xff] %v771_v44 }
 0x274   : > { %v826_v46 = vld [vmem:[%s203_s24] sm:$0xff]  ;;  %v828_v47 = vld [vmem:[%s203_s24 + $0x8] sm:$0xff] }
 0x275   : > { %827 = vst [vmem:[%s795_s10] sm:$0xff] %v826_v46  ;;  %829 = vst [vmem:[%s795_s10 + $0x10] sm:$0xff] %v828_v47 }
 0x276 PF: > { %s15_s21 = sadd.s32 1, %s1204_s21   ;;  %s1642_s15 = smov %s1184_s16 }
 0x277   : > { %p12_p11 = scmp.ge.s32.totalorder %s15_s21, 6   ;;  %s1643_s16 = smov %s1327_s30 }
 0x278   : > { %s1644_s17 = smov %s1196_s19  ;;  %s1645_s18 = smov %s1200_s20 }
 0x279   : > { %s1646_s19 = smov %s1649_s22  ;;  %s1647_s20 = smov %s1653_s23 }
 0x27a   :  { %14 = sbr.rel (!%p12_p11) target bundleno = 4 (0x4), region = 113 }

</bundles_post_ra>
